<compile_context>
chip_gen: v5e
topology: v5e:2x2
jax: 0.10.0
libtpu: 0.0.40
codegen_flags: <defaults>
</compile_context>

<pallas_src>
import jax
import jax.numpy as jnp
from jax.experimental import pallas as pl
from jax.experimental.pallas import tpu as pltpu

EMBED_DIM = 16
NUM_CROSS_LAYERS = 2
HIDDEN = (256, 128)
BN_EPS = 1e-5

# ------------------------- feature-index "config" ---------------------------
# item_features: (B, 6) -> cols 0,1 numeric; col 2 cate-id (voc 10); cols 3..5 one-hot
# user_features: (B, 5) -> col 0 numeric;  col 1 cate-id (voc 8);  cols 2..4 one-hot
ITEM_NUME_IDX = [0, 1]
ITEM_CATE_ID_IDX = [(2, 10)]
ITEM_CATE_OH_IDX = [(3, 5)]          # voc = 5-3+1+1 = 4
USER_NUME_IDX = [0]
USER_CATE_ID_IDX = [(1, 8)]
USER_CATE_OH_IDX = [(2, 4)]          # voc = 4-2+1+1 = 4
NUM_ITEM_ID = 50
NUM_USER_ID = 40

NUME_FEATURE_SIZE = len(ITEM_NUME_IDX) + len(USER_NUME_IDX)            # 3
CATE_FEATURE_SIZE = (len(ITEM_CATE_ID_IDX) + len(ITEM_CATE_OH_IDX)
                     + len(USER_CATE_ID_IDX) + len(USER_CATE_OH_IDX))  # 4
ALL_SIZE = CATE_FEATURE_SIZE + 2 + (1 if NUME_FEATURE_SIZE != 0 else 0)  # 7
DNN_IN = ALL_SIZE * EMBED_DIM                                            # 112
PAD_FIELDS = 8                      # 8 * 16 = 128 -> lane-dense at stack time


def _round_up(x, m):
    return ((x + m - 1) // m) * m


def _choose_tb(B, block_batch):
    """Batch tile: as large as block_batch allows (amortize per-step overhead
    and MXU weight-load/drain), but capped so the grid has >= 2 steps whenever
    the batch allows it (v7x has 2 TensorCores; no-op on v5e/v6e)."""
    bp8 = _round_up(B, 8)
    tb = min(_round_up(block_batch, 8), bp8)
    if bp8 >= 16:
        tb = min(tb, _round_up((bp8 + 1) // 2, 8))
    return max(8, tb)


# ------------------------------ Pallas kernel --------------------------------
def dcn_kernel(flat_ref, rhs0_ref, cm_ref, cb_ref, b1_ref, w2_ref, b2_ref,
               wch_ref, wdh_ref, bo_ref, out_ref):
    mxu_dt = rhs0_ref.dtype
    Kp = flat_ref.shape[-1]

    x0 = flat_ref[...]                       # (TB, Kp), act dtype (bf16 or f32)
    x0_mx = x0.astype(mxu_dt)                # hoisted: single cast, reused below
    x0_f = x0.astype(jnp.float32)            # f32 elementwise path (v5e-safe)

    # ---- fused MXU pass: cross layer 0 "xw" + first DNN linear --------------
    # Both consume the same LHS x0; packing the RHS as [cm0 | w1] gives one
    # LHS stream / one MXU weight-load instead of two.
    fused = jnp.dot(x0_mx, rhs0_ref[...], preferred_element_type=jnp.float32)
    xw = fused[:, :Kp]                       # (TB, Kp)  per-field <x0, w0> bcast
    h = fused[:, Kp:] + b1_ref[...]          # (TB, H1)  BN folded into w1/b1

    # ---- CrossNetwork on the flat lane-dense layout --------------------------
    # (x @ M_l)[b, f*E+e'] = sum_e x[b,f,e] * w_l[e]; M_l = kron(I_F, w_l 1_E^T)
    x = x0_f * xw + cb_ref[0] + x0_f
    for i in range(1, NUM_CROSS_LAYERS):
        xw = jnp.dot(x.astype(mxu_dt), cm_ref[i - 1],
                     preferred_element_type=jnp.float32)
        x = x0_f * xw + cb_ref[i] + x        # f32 elementwise (v5e VPU: no bf16)

    # ---- DNN tower (eval-mode BN folded in wrapper; dropout off) -------------
    h = jnp.maximum(h, 0.0)
    h = jnp.dot(h.astype(mxu_dt), w2_ref[...],
                preferred_element_type=jnp.float32) + b2_ref[...]
    h = jnp.maximum(h, 0.0)

    # ---- folded output head: VPU multiply + XLU lane-reduce (not MXU) --------
    out = (jnp.sum(x * wch_ref[...], axis=-1, keepdims=True)
           + jnp.sum(h * wdh_ref[...], axis=-1, keepdims=True)
           + bo_ref[...])
    out_ref[...] = out.astype(out_ref.dtype)


def dcn_pallas(feature_emb, params, *, num_real_fields=ALL_SIZE,
               block_batch=1024, act_dtype=jnp.bfloat16, mxu_dtype=jnp.bfloat16):
    B, F_in, E = feature_emb.shape
    K_in = F_in * E                          # lanes actually present in the input
    K = num_real_fields * E                  # lanes carrying real features
    Kp = _round_up(max(K_in, K), 128)
    H1 = params["w1"].shape[1]
    H2 = params["w2"].shape[1]
    L = NUM_CROSS_LAYERS

    # ---- batch-independent weight folding / packing --------------------------
    eye_f = jnp.eye(num_real_fields, dtype=jnp.float32)
    ones_e = jnp.ones((E,), jnp.float32)
    cms = [jnp.pad(jnp.kron(eye_f, jnp.outer(params["cross_w"][l], ones_e)),
                   ((0, Kp - K), (0, Kp - K))) for l in range(L)]        # (Kp,Kp) f32
    cb = jnp.stack([jnp.pad(jnp.tile(params["cross_b"][l], num_real_fields),
                            (0, Kp - K)) for l in range(L)])[:, None, :]  # (L,1,Kp)

    # Fold eval-mode BatchNorm into the hidden linears.
    s1 = params["bn1_gamma"] * jax.lax.rsqrt(params["bn1_var"] + BN_EPS)
    t1 = params["bn1_beta"] - params["bn1_mean"] * s1
    s2 = params["bn2_gamma"] * jax.lax.rsqrt(params["bn2_var"] + BN_EPS)
    t2 = params["bn2_beta"] - params["bn2_mean"] * s2
    w1f = jnp.pad(params["w1"] * s1[None, :], ((0, Kp - K), (0, 0)))      # (Kp,H1)
    b1f = (params["b1"] * s1 + t1).reshape(1, H1).astype(jnp.float32)
    w2f = (params["w2"] * s2[None, :]).astype(mxu_dtype)
    b2f = (params["b2"] * s2 + t2).reshape(1, H2).astype(jnp.float32)

    # Pack cross layer 0 + first DNN linear into one RHS; remaining cross layers.
    rhs0 = jnp.concatenate([cms[0], w1f], axis=1).astype(mxu_dtype)       # (Kp,Kp+H1)
    cm_rest = jnp.stack(cms[1:]).astype(mxu_dtype)                        # (L-1,Kp,Kp)

    # Fold the output head: mean over fields + concat + output_fc -> row vectors.
    wo = params["wo"]
    wch = jnp.pad(jnp.tile(wo[:E, 0], num_real_fields) / num_real_fields,
                  (0, Kp - K)).reshape(1, Kp)
    wdh = (params["w3"] @ wo[E:]).reshape(1, H2)
    bo = params["bo"].reshape(1, 1)

    # ---- lane-dense activation input (bf16 by default), batch-tiled ----------
    flat = feature_emb.reshape(B, K_in).astype(act_dtype)
    TB = _choose_tb(B, block_batch)
    Bp = _round_up(B, TB)
    if Bp != B or K_in != Kp:                # pad only if actually needed
        flat = jnp.pad(flat, ((0, Bp - B), (0, Kp - K_in)))
    nb = Bp // TB

    c2 = lambda i: (0, 0)
    c3 = lambda i: (0, 0, 0)
    out = pl.pallas_call(
        dcn_kernel,
        out_shape=jax.ShapeDtypeStruct((Bp, 1), jnp.float32),
        grid=(nb,),
        in_specs=[
            pl.BlockSpec((TB, Kp), lambda i: (i, 0)),      # activations (batch-tiled)
            pl.BlockSpec((Kp, Kp + H1), c2),               # packed [cross0 | w1(BN)]
            pl.BlockSpec((L - 1, Kp, Kp), c3),             # cross layers 1..L-1
            pl.BlockSpec((L, 1, Kp), c3),                  # cross biases (tiled)
            pl.BlockSpec((1, H1), c2),                     # b1 (BN folded)
            pl.BlockSpec((H1, H2), c2),                    # w2 (BN folded)
            pl.BlockSpec((1, H2), c2),                     # b2 (BN folded)
            pl.BlockSpec((1, Kp), c2),                     # head: cross row vector
            pl.BlockSpec((1, H2), c2),                     # head: dnn row vector
            pl.BlockSpec((1, 1), c2),                      # bo
        ],
        out_specs=pl.BlockSpec((TB, 1), lambda i: (i, 0)),
        compiler_params=pltpu.CompilerParams(
            dimension_semantics=("parallel",)),            # v7x: batch over 2 TCs
    )(flat, rhs0, cm_rest, cb, b1f, w2f, b2f, wch, wdh, bo)
    return out[:B]


# ---------------------------- plain-JAX reference ----------------------------
def dcn_reference(feature_emb, params):
    x0 = feature_emb
    x = x0
    for i in range(NUM_CROSS_LAYERS):
        xw = jnp.einsum("bfe,e->bf", x, params["cross_w"][i])[..., None]
        x = x0 * xw + params["cross_b"][i] + x
    cross_out = jnp.mean(x, axis=1)

    s1 = params["bn1_gamma"] / jnp.sqrt(params["bn1_var"] + BN_EPS)
    t1 = params["bn1_beta"] - params["bn1_mean"] * s1
    s2 = params["bn2_gamma"] / jnp.sqrt(params["bn2_var"] + BN_EPS)
    t2 = params["bn2_beta"] - params["bn2_mean"] * s2

    flat = x0.reshape(x0.shape[0], -1)
    h = jnp.maximum((flat @ params["w1"] + params["b1"]) * s1 + t1, 0.0)
    h = jnp.maximum((h @ params["w2"] + params["b2"]) * s2 + t2, 0.0)
    dnn_out = h @ params["w3"]
    cat = jnp.concatenate([cross_out, dnn_out], axis=1)
    return cat @ params["wo"] + params["bo"]


# ------------------------ feature embedding assembly (glue) ------------------
def build_feature_emb(params, user_id, target_item_id, user_features, item_features,
                      pad_to_fields=None):
    feats = []
    feats.append(params["item_emb_table"][target_item_id[:, 0]])   # item_embedding(...).squeeze(1)
    feats.append(params["user_emb_table"][user_id[:, 0]])          # user_embedding(...).squeeze(1)

    for (idx, _voc), tbl in zip(ITEM_CATE_ID_IDX, [params["item_cate_emb"]]):
        feats.append(tbl[item_features[:, idx].astype(jnp.int32)])
    for (s, e), tbl in zip(ITEM_CATE_OH_IDX, [params["item_oh_emb"]]):
        oh = item_features[:, s:e + 1]
        oh = jnp.concatenate([jnp.zeros((oh.shape[0], 1), oh.dtype), oh], axis=1)
        feats.append(oh @ tbl)
    for (idx, _voc), tbl in zip(USER_CATE_ID_IDX, [params["user_cate_emb"]]):
        feats.append(tbl[user_features[:, idx].astype(jnp.int32)])
    for (s, e), tbl in zip(USER_CATE_OH_IDX, [params["user_oh_emb"]]):
        oh = user_features[:, s:e + 1]
        oh = jnp.concatenate([jnp.zeros((oh.shape[0], 1), oh.dtype), oh], axis=1)
        feats.append(oh @ tbl)

    dense = jnp.concatenate(
        [item_features[:, i:i + 1] for i in ITEM_NUME_IDX]
        + [user_features[:, i:i + 1] for i in USER_NUME_IDX], axis=1)
    feats.append(dense @ params["dense_w"] + params["dense_b"])

    # Lane-dense padding at stack time: append zero fields so F*E hits 128,
    # avoiding a separate full-batch pad pass before the kernel.
    if pad_to_fields is not None and len(feats) < pad_to_fields:
        zero = jnp.zeros_like(feats[0])
        feats.extend([zero] * (pad_to_fields - len(feats)))
    return jnp.stack(feats, axis=1)          # (B, n_fields, EMBED_DIM)


# ----------------------------- parameter init --------------------------------
def init_params(key):
    ks = iter(jax.random.split(key, 32))
    n = lambda shape, scale=0.1: (scale * jax.random.normal(next(ks), shape)).astype(jnp.float32)
    return {
        "item_emb_table": n((NUM_ITEM_ID, EMBED_DIM)),
        "user_emb_table": n((NUM_USER_ID, EMBED_DIM)),
        "item_cate_emb": n((ITEM_CATE_ID_IDX[0][1], EMBED_DIM)),
        "item_oh_emb": n((ITEM_CATE_OH_IDX[0][1] - ITEM_CATE_OH_IDX[0][0] + 2, EMBED_DIM)),
        "user_cate_emb": n((USER_CATE_ID_IDX[0][1], EMBED_DIM)),
        "user_oh_emb": n((USER_CATE_OH_IDX[0][1] - USER_CATE_OH_IDX[0][0] + 2, EMBED_DIM)),
        "dense_w": n((NUME_FEATURE_SIZE, EMBED_DIM)),
        "dense_b": n((EMBED_DIM,)),
        "cross_w": n((NUM_CROSS_LAYERS, EMBED_DIM)),
        "cross_b": n((NUM_CROSS_LAYERS, EMBED_DIM)),
        "w1": n((DNN_IN, HIDDEN[0])),
        "b1": n((HIDDEN[0],)),
        "bn1_gamma": jnp.ones((HIDDEN[0],), jnp.float32),
        "bn1_beta": n((HIDDEN[0],)),
        "bn1_mean": n((HIDDEN[0],)),
        "bn1_var": jnp.abs(n((HIDDEN[0],))) + 1.0,
        "w2": n((HIDDEN[0], HIDDEN[1])),
        "b2": n((HIDDEN[1],)),
        "bn2_gamma": jnp.ones((HIDDEN[1],), jnp.float32),
        "bn2_beta": n((HIDDEN[1],)),
        "bn2_mean": n((HIDDEN[1],)),
        "bn2_var": jnp.abs(n((HIDDEN[1],))) + 1.0,
        "w3": n((HIDDEN[1], EMBED_DIM)),
        "wo": n((2 * EMBED_DIM, 1)),
        "bo": n((1,)),
    }


def make_inputs(key, B):
    k1, k2, k5, k6, k7, k8 = jax.random.split(key, 6)
    user_id = jax.random.randint(k1, (B, 1), 0, NUM_USER_ID, dtype=jnp.int32)
    target_item_id = jax.random.randint(k2, (B, 1), 0, NUM_ITEM_ID, dtype=jnp.int32)
    item_features = jnp.concatenate([
        jax.random.normal(k5, (B, 2), jnp.float32),                                     # numeric 0,1
        jax.random.randint(k6, (B, 1), 0, ITEM_CATE_ID_IDX[0][1]).astype(jnp.float32),  # cate-id 2
        jax.random.bernoulli(k7, 0.5, (B, 3)).astype(jnp.float32),                      # one-hot 3..5
    ], axis=1)
    user_features = jnp.concatenate([
        jax.random.normal(k8, (B, 1), jnp.float32),                                     # numeric 0
        jax.random.randint(k6, (B, 1), 0, USER_CATE_ID_IDX[0][1]).astype(jnp.float32),  # cate-id 1
        jax.random.bernoulli(k7, 0.5, (B, 3)).astype(jnp.float32),                      # one-hot 2..4
    ], axis=1)
    return user_id, target_item_id, user_features, item_features


# ---------------------------------- main --------------------------------------
if __name__ == "__main__":
    key = jax.random.PRNGKey(0)
    kp, kin, kin2, kin3 = jax.random.split(key, 4)
    params = init_params(kp)

    # history_item_id / history_len are accepted by the PyTorch forward but unused.

    # ---- small batch: f32 MXU / f32 activations, tight check -----------------
    B = 8
    uid, tid, uf, itf = make_inputs(kin, B)
    fe_pad = build_feature_emb(params, uid, tid, uf, itf, pad_to_fields=PAD_FIELDS)  # (B,8,16)
    ref = dcn_reference(fe_pad[:, :ALL_SIZE, :], params)

    out = jax.block_until_ready(
        dcn_pallas(fe_pad, params, act_dtype=jnp.float32, mxu_dtype=jnp.float32))
    assert out.shape == (B, 1), out.shape
    assert jnp.allclose(out, ref, rtol=2e-2, atol=2e-3), (out, ref)

    # bf16 activations + bf16 MXU (fast path on v6e/v7x): looser check.
    out_bf16 = jax.block_until_ready(dcn_pallas(fe_pad, params))
    assert jnp.allclose(out_bf16, ref, rtol=1e-1, atol=2e-2), (out_bf16, ref)

    # ---- exercise the batch grid: multiple blocks + padded tail rows ---------
    B2 = 20
    uid2, tid2, uf2, itf2 = make_inputs(kin2, B2)
    fe2 = build_feature_emb(params, uid2, tid2, uf2, itf2, pad_to_fields=PAD_FIELDS)
    out2 = jax.block_until_ready(
        dcn_pallas(fe2, params, block_batch=8,
                   act_dtype=jnp.float32, mxu_dtype=jnp.float32))
    ref2 = dcn_reference(fe2[:, :ALL_SIZE, :], params)
    assert out2.shape == (B2, 1), out2.shape
    assert jnp.allclose(out2, ref2, rtol=2e-2, atol=2e-3), (out2, ref2)

    # ---- larger batch: default bf16 path, >= 2 grid steps (both v7x TCs) ------
    B3 = 512
    uid3, tid3, uf3, itf3 = make_inputs(kin3, B3)
    fe3 = build_feature_emb(params, uid3, tid3, uf3, itf3, pad_to_fields=PAD_FIELDS)
    out3 = jax.block_until_ready(dcn_pallas(fe3, params))
    ref3 = dcn_reference(fe3[:, :ALL_SIZE, :], params)
    assert out3.shape == (B3, 1), out3.shape
    assert jnp.allclose(out3, ref3, rtol=1e-1, atol=2e-2), (out3, ref3)

    print("KERNEL_OK")
</pallas_src>

<mosaic_0001>
module attributes {stable_mosaic.version = 11 : i64} {
  func.func @dcn_kernel(%arg0: i32, %arg1: memref<8x128xf32, #tpu.memory_space<vmem>>, %arg2: memref<128x384xf32, #tpu.memory_space<vmem>>, %arg3: memref<1x128x128xf32, #tpu.memory_space<vmem>>, %arg4: memref<2x1x128xf32, #tpu.memory_space<vmem>>, %arg5: memref<1x256xf32, #tpu.memory_space<vmem>>, %arg6: memref<256x128xf32, #tpu.memory_space<vmem>>, %arg7: memref<1x128xf32, #tpu.memory_space<vmem>>, %arg8: memref<1x128xf32, #tpu.memory_space<vmem>>, %arg9: memref<1x128xf32, #tpu.memory_space<vmem>>, %arg10: memref<1x1xf32, #tpu.memory_space<vmem>>, %arg11: memref<8x1xf32, #tpu.memory_space<vmem>>) attributes {dimension_semantics = [#tpu.dimension_semantics<parallel>], iteration_bounds = array<i64: 1>, scalar_prefetch = 0 : i64, scratch_operands = 0 : i64, tpu.core_type = #tpu.core_type<tc>, window_params = [{transform_indices = @transform_0, window_bounds = array<i64: 8, 128>}, {pipeline_mode = #tpu.pipeline_mode<synchronous>, transform_indices = @transform_1, window_bounds = array<i64: 128, 384>}, {pipeline_mode = #tpu.pipeline_mode<synchronous>, transform_indices = @transform_2, window_bounds = array<i64: 1, 128, 128>}, {pipeline_mode = #tpu.pipeline_mode<synchronous>, transform_indices = @transform_3, window_bounds = array<i64: 2, 1, 128>}, {pipeline_mode = #tpu.pipeline_mode<synchronous>, transform_indices = @transform_4, window_bounds = array<i64: 1, 256>}, {pipeline_mode = #tpu.pipeline_mode<synchronous>, transform_indices = @transform_5, window_bounds = array<i64: 256, 128>}, {pipeline_mode = #tpu.pipeline_mode<synchronous>, transform_indices = @transform_6, window_bounds = array<i64: 1, 128>}, {pipeline_mode = #tpu.pipeline_mode<synchronous>, transform_indices = @transform_7, window_bounds = array<i64: 1, 128>}, {pipeline_mode = #tpu.pipeline_mode<synchronous>, transform_indices = @transform_8, window_bounds = array<i64: 1, 128>}, {pipeline_mode = #tpu.pipeline_mode<synchronous>, transform_indices = @transform_9, window_bounds = array<i64: 1, 1>}, {transform_indices = @transform_10, window_bounds = array<i64: 8, 1>}]} {
    %c0 = arith.constant 0 : index
    %c0_0 = arith.constant 0 : index
    %0 = vector.load %arg1[%c0, %c0_0] : memref<8x128xf32, #tpu.memory_space<vmem>>, vector<8x128xf32>
    %c0_1 = arith.constant 0 : index
    %c0_2 = arith.constant 0 : index
    %1 = vector.load %arg2[%c0_1, %c0_2] : memref<128x384xf32, #tpu.memory_space<vmem>>, vector<128x384xf32>
    %cst = arith.constant dense<0.000000e+00> : vector<8x384xf32>
    %2 = tpu.matmul %0, %1, %cst {dimension_numbers = #tpu.dot_dimension_numbers<[1], [0], [0], [1], [0, 0, 1, 1], [], []>} : vector<8x128xf32>, vector<128x384xf32>, vector<8x384xf32> -> vector<8x384xf32>
    %3 = vector.extract_strided_slice %2 {offsets = [0, 0], sizes = [8, 128], strides = [1, 1]} : vector<8x384xf32> to vector<8x128xf32>
    %4 = vector.extract_strided_slice %2 {offsets = [0, 128], sizes = [8, 256], strides = [1, 1]} : vector<8x384xf32> to vector<8x256xf32>
    %c0_3 = arith.constant 0 : index
    %c0_4 = arith.constant 0 : index
    %5 = vector.load %arg5[%c0_3, %c0_4] : memref<1x256xf32, #tpu.memory_space<vmem>>, vector<1x256xf32>
    %6 = vector.broadcast %5 : vector<1x256xf32> to vector<8x256xf32>
    %7 = arith.addf %4, %6 : vector<8x256xf32>
    %8 = arith.mulf %0, %3 : vector<8x128xf32>
    %c0_5 = arith.constant 0 : index
    %c0_6 = arith.constant 0 : index
    %c0_7 = arith.constant 0 : index
    %9 = vector.load %arg4[%c0_5, %c0_6, %c0_7] : memref<2x1x128xf32, #tpu.memory_space<vmem>>, vector<1x1x128xf32>
    %10 = vector.shape_cast %9 : vector<1x1x128xf32> to vector<1x128xf32>
    %11 = vector.broadcast %10 : vector<1x128xf32> to vector<8x128xf32>
    %12 = arith.addf %8, %11 : vector<8x128xf32>
    %13 = arith.addf %12, %0 : vector<8x128xf32>
    %c0_8 = arith.constant 0 : index
    %c0_9 = arith.constant 0 : index
    %c0_10 = arith.constant 0 : index
    %14 = vector.load %arg3[%c0_8, %c0_9, %c0_10] : memref<1x128x128xf32, #tpu.memory_space<vmem>>, vector<1x128x128xf32>
    %15 = vector.shape_cast %14 : vector<1x128x128xf32> to vector<128x128xf32>
    %cst_11 = arith.constant dense<0.000000e+00> : vector<8x128xf32>
    %16 = tpu.matmul %13, %15, %cst_11 {dimension_numbers = #tpu.dot_dimension_numbers<[1], [0], [0], [1], [0, 0, 1, 1], [], []>} : vector<8x128xf32>, vector<128x128xf32>, vector<8x128xf32> -> vector<8x128xf32>
    %17 = arith.mulf %0, %16 : vector<8x128xf32>
    %c1 = arith.constant 1 : index
    %c0_12 = arith.constant 0 : index
    %c0_13 = arith.constant 0 : index
    %18 = vector.load %arg4[%c1, %c0_12, %c0_13] : memref<2x1x128xf32, #tpu.memory_space<vmem>>, vector<1x1x128xf32>
    %19 = vector.shape_cast %18 : vector<1x1x128xf32> to vector<1x128xf32>
    %20 = vector.broadcast %19 : vector<1x128xf32> to vector<8x128xf32>
    %21 = arith.addf %17, %20 : vector<8x128xf32>
    %22 = arith.addf %21, %13 : vector<8x128xf32>
    %cst_14 = arith.constant 0.000000e+00 : f32
    %23 = vector.broadcast %cst_14 : f32 to vector<8x256xf32>
    %24 = arith.maximumf %7, %23 : vector<8x256xf32>
    %c0_15 = arith.constant 0 : index
    %c0_16 = arith.constant 0 : index
    %25 = vector.load %arg6[%c0_15, %c0_16] : memref<256x128xf32, #tpu.memory_space<vmem>>, vector<256x128xf32>
    %cst_17 = arith.constant dense<0.000000e+00> : vector<8x128xf32>
    %26 = tpu.matmul %24, %25, %cst_17 {dimension_numbers = #tpu.dot_dimension_numbers<[1], [0], [0], [1], [0, 0, 1, 1], [], []>} : vector<8x256xf32>, vector<256x128xf32>, vector<8x128xf32> -> vector<8x128xf32>
    %c0_18 = arith.constant 0 : index
    %c0_19 = arith.constant 0 : index
    %27 = vector.load %arg7[%c0_18, %c0_19] : memref<1x128xf32, #tpu.memory_space<vmem>>, vector<1x128xf32>
    %28 = vector.broadcast %27 : vector<1x128xf32> to vector<8x128xf32>
    %29 = arith.addf %26, %28 : vector<8x128xf32>
    %cst_20 = arith.constant 0.000000e+00 : f32
    %30 = vector.broadcast %cst_20 : f32 to vector<8x128xf32>
    %31 = arith.maximumf %29, %30 : vector<8x128xf32>
    %c0_21 = arith.constant 0 : index
    %c0_22 = arith.constant 0 : index
    %32 = vector.load %arg8[%c0_21, %c0_22] : memref<1x128xf32, #tpu.memory_space<vmem>>, vector<1x128xf32>
    %33 = vector.broadcast %32 : vector<1x128xf32> to vector<8x128xf32>
    %34 = arith.mulf %22, %33 : vector<8x128xf32>
    %cst_23 = arith.constant dense<0.000000e+00> : vector<8xf32>
    %35 = vector.multi_reduction <add>, %34, %cst_23 [1] : vector<8x128xf32> to vector<8xf32>
    %36 = vector.shape_cast %35 : vector<8xf32> to vector<8x1xf32>
    %c0_24 = arith.constant 0 : index
    %c0_25 = arith.constant 0 : index
    %37 = vector.load %arg9[%c0_24, %c0_25] : memref<1x128xf32, #tpu.memory_space<vmem>>, vector<1x128xf32>
    %38 = vector.broadcast %37 : vector<1x128xf32> to vector<8x128xf32>
    %39 = arith.mulf %31, %38 : vector<8x128xf32>
    %cst_26 = arith.constant dense<0.000000e+00> : vector<8xf32>
    %40 = vector.multi_reduction <add>, %39, %cst_26 [1] : vector<8x128xf32> to vector<8xf32>
    %41 = vector.shape_cast %40 : vector<8xf32> to vector<8x1xf32>
    %42 = arith.addf %36, %41 : vector<8x1xf32>
    %c0_27 = arith.constant 0 : index
    %c0_28 = arith.constant 0 : index
    %43 = vector.load %arg10[%c0_27, %c0_28] : memref<1x1xf32, #tpu.memory_space<vmem>>, vector<1x1xf32>
    %44 = vector.broadcast %43 : vector<1x1xf32> to vector<8x1xf32>
    %45 = arith.addf %42, %44 : vector<8x1xf32>
    %c0_29 = arith.constant 0 : index
    %c0_30 = arith.constant 0 : index
    %46 = vector.load %arg11[%c0_29, %c0_30] : memref<8x1xf32, #tpu.memory_space<vmem>>, vector<8x1xf32>
    tpu.vector_store %arg11[%c0_29, %c0_30], %45 {strides = array<i32>} : memref<8x1xf32, #tpu.memory_space<vmem>>, vector<8x1xf32>,
    return
  }
  func.func @transform_0(%arg0: i32) -> (i32, i32) {
    %c0_i32 = arith.constant 0 : i32
    %c0_i32_0 = arith.constant 0 : i32
    return %arg0, %c0_i32 : i32, i32
  }
  func.func @transform_1(%arg0: i32) -> (i32, i32) {
    %c0_i32 = arith.constant 0 : i32
    %c0_i32_0 = arith.constant 0 : i32
    %c0_i32_1 = arith.constant 0 : i32
    return %c0_i32, %c0_i32_0 : i32, i32
  }
  func.func @transform_2(%arg0: i32) -> (i32, i32, i32) {
    %c0_i32 = arith.constant 0 : i32
    %c0_i32_0 = arith.constant 0 : i32
    %c0_i32_1 = arith.constant 0 : i32
    %c0_i32_2 = arith.constant 0 : i32
    return %c0_i32, %c0_i32_0, %c0_i32_1 : i32, i32, i32
  }
  func.func @transform_3(%arg0: i32) -> (i32, i32, i32) {
    %c0_i32 = arith.constant 0 : i32
    %c0_i32_0 = arith.constant 0 : i32
    %c0_i32_1 = arith.constant 0 : i32
    %c0_i32_2 = arith.constant 0 : i32
    return %c0_i32, %c0_i32_0, %c0_i32_1 : i32, i32, i32
  }
  func.func @transform_4(%arg0: i32) -> (i32, i32) {
    %c0_i32 = arith.constant 0 : i32
    %c0_i32_0 = arith.constant 0 : i32
    %c0_i32_1 = arith.constant 0 : i32
    return %c0_i32, %c0_i32_0 : i32, i32
  }
  func.func @transform_5(%arg0: i32) -> (i32, i32) {
    %c0_i32 = arith.constant 0 : i32
    %c0_i32_0 = arith.constant 0 : i32
    %c0_i32_1 = arith.constant 0 : i32
    return %c0_i32, %c0_i32_0 : i32, i32
  }
  func.func @transform_6(%arg0: i32) -> (i32, i32) {
    %c0_i32 = arith.constant 0 : i32
    %c0_i32_0 = arith.constant 0 : i32
    %c0_i32_1 = arith.constant 0 : i32
    return %c0_i32, %c0_i32_0 : i32, i32
  }
  func.func @transform_7(%arg0: i32) -> (i32, i32) {
    %c0_i32 = arith.constant 0 : i32
    %c0_i32_0 = arith.constant 0 : i32
    %c0_i32_1 = arith.constant 0 : i32
    return %c0_i32, %c0_i32_0 : i32, i32
  }
  func.func @transform_8(%arg0: i32) -> (i32, i32) {
    %c0_i32 = arith.constant 0 : i32
    %c0_i32_0 = arith.constant 0 : i32
    %c0_i32_1 = arith.constant 0 : i32
    return %c0_i32, %c0_i32_0 : i32, i32
  }
  func.func @transform_9(%arg0: i32) -> (i32, i32) {
    %c0_i32 = arith.constant 0 : i32
    %c0_i32_0 = arith.constant 0 : i32
    %c0_i32_1 = arith.constant 0 : i32
    return %c0_i32, %c0_i32_0 : i32, i32
  }
  func.func @transform_10(%arg0: i32) -> (i32, i32) {
    %c0_i32 = arith.constant 0 : i32
    %c0_i32_0 = arith.constant 0 : i32
    return %arg0, %c0_i32 : i32, i32
  }
}

</mosaic_0001>

<bundles_post_ra>
// kernel: tpu_custom_call.1
= control target key start
LH: loop header
LB: loop body
LE: loop exit
PB: predicated region body
PF: predicated region fallthrough
CT: control target
= control target key end

     0   :  { %s598_s0 = inlined_call_operand.hbm [shape: f32[8,128], index: 0, kind: input, shape index: {}]   ;;  %s599_s1 = inlined_call_operand.hbm [shape: f32[128,384], index: 1, kind: input, shape index: {}]   ;;  %s600_s2 = inlined_call_operand.hbm [shape: f32[1,128,128], index: 2, kind: input, shape index: {}]   ;;  %s601_s3 = inlined_call_operand.vmem [shape: f32[2,1,128], index: 3, kind: input, shape index: {}]   ;;  %s602_s4 = inlined_call_operand.vmem [shape: f32[1,256], index: 4, kind: input, shape index: {}]   ;;  %s603_s5 = inlined_call_operand.hbm [shape: f32[256,128], index: 5, kind: input, shape index: {}]   ;;  %s604_s6 = inlined_call_operand.vmem [shape: f32[1,128], index: 6, kind: input, shape index: {}]   ;;  %s605_s7 = inlined_call_operand.vmem [shape: f32[1,128], index: 7, kind: input, shape index: {}]   ;;  %s606_s8 = inlined_call_operand.vmem [shape: f32[1,128], index: 8, kind: input, shape index: {}]   ;;  %s607_s9 = inlined_call_operand.<no memory space> [shape: f32[1,1], index: 9, kind: input, shape index: {}]   ;;  %s608_s10 = inlined_call_operand.vmem [shape: f32[8,1], index: 10, kind: output, shape index: {}]  }
   0x1   :  { %v15_v0 = vstv %s607_s9 }
   0x2   :  { %16 = vst [vmem:[#allocation2] sm:$0x1] %v15_v0 }
   0x3   :  { %17 = vsyncpa [#allocation4], 0 }
   0x4   :  { %18 = vsyncpa [#allocation6], 0  ;;  %s35_s17 = sshll.u32 %s599_s1, 4  ;;  %s36_s17 = int_to_ptr.hbm [resolvable:$true] %s35_s17 }
   0x5   :  { %19 = vsyncpa [#allocation9], 0  ;;  %s491_s18 = smov [#allocation5]   ;;  %s25_s22 = sshll.u32 %s598_s0, 4  ;;  %s26_s22 = int_to_ptr.hbm [resolvable:$true] %s25_s22 }
   0x6   :  { %s37_s19 = sshll.u32 %s491_s18, 4  ;;  %s492_s23 = smov 384   ;;  %s38_s19 = int_to_ptr.vmem [resolvable:$true] %s37_s19 }
   0x7   :  { %s493_s24 = smov 24   ;;  %s494_s9 = smov [#allocation3]  }
   0x8   :  { %43 = dma.hbm_to_vmem [thread:$0]  %s36_s17, 6144, %s38_s19, [#allocation6], %s492_s23, %s492_s23, %s493_s24  }
   0x9   :  { %s27_s25 = sshll.u32 %s494_s9, 4  ;;  %s48_s28 = sshll.u32 %s600_s2, 4  ;;  %s28_s25 = int_to_ptr.vmem [resolvable:$true] %s27_s25  ;;  %s49_s28 = int_to_ptr.hbm [resolvable:$true] %s48_s28 }
   0xa   :  { %30 = dma.hbm_to_vmem [thread:$0]  %s26_s22, 128, %s28_s25, [#allocation4]  }
   0xb   :  { %s495_s1 = smov [#allocation7]   ;;  %s65_s0 = sshll.u32 %s603_s5, 4  ;;  %s66_s0 = int_to_ptr.hbm [resolvable:$true] %s65_s0 }
   0xc   :  { %s50_s29 = sshll.u32 %s495_s1, 4  ;;  %s496_s12 = smov 128   ;;  %s51_s29 = int_to_ptr.vmem [resolvable:$true] %s50_s29 }
   0xd   :  { %s497_s13 = smov 8   ;;  %s498_s14 = smov [#allocation8]  }
   0xe   :  { %56 = dma.hbm_to_vmem [thread:$0]  %s49_s28, 2048, %s51_s29, [#allocation6], %s496_s12, %s496_s12, %s497_s13  }
   0xf   :  { %s67_s15 = sshll.u32 %s498_s14, 4  ;;  %s68_s15 = int_to_ptr.vmem [resolvable:$true] %s67_s15 }
  0x10   :  { %73 = dma.hbm_to_vmem [thread:$0]  %s66_s0, 4096, %s68_s15, [#allocation9], %s496_s12, %s496_s12, %s497_s13  }
  0x11   :  { %485 = dma.done.wait [#allocation4], 128  }
  0x12   :  { %486 = vsyncadd [#allocation4], 4294967168 }
  0x13   :  { %487 = dma.done.wait [#allocation6], 8192  }
  0x14   :  { %488 = vsyncadd [#allocation6], 4294959104 }
  0x15   :  { %489 = dma.done.wait [#allocation9], 4096  }
  0x16   :  { %490 = vsyncadd [#allocation9], 4294963200  ;;  %v144_v1 = vld [vmem:[#allocation5 + $0x168] sm:$0xff]  ;;  %v141_v2 = vld [vmem:[#allocation5 + $0x150] sm:$0xff]  ;;  %vm365_vm0 = vcmask 7168  }
  0x17   :  { %147 = vmatpush.msra.mxu0 %v144_v1  ;;  %v138_v3 = vld [vmem:[#allocation5 + $0x138] sm:$0xff]  ;;  %v143_v5 = vld [vmem:[#allocation5 + $0x160] sm:$0xff]  ;;  %v145_v6 = vld [vmem:[#allocation5 + $0x170] sm:$0xff] }
  0x18   :  { %v146_v4 = vld [vmem:[#allocation5 + $0x178] sm:$0xff]  ;;  %v135_v7 = vld [vmem:[#allocation5 + $0x120] sm:$0xff]  ;;  %167 = vmatpush.msra.mxu1 %v145_v6  ;;  %v140_v8 = vld [vmem:[#allocation5 + $0x148] sm:$0xff] }
  0x19   :  { %148 = vmatpush.msra.mxu0 %v141_v2  ;;  %187 = vmatpush.msra.mxu2 %v146_v4  ;;  %v142_v9 = vld [vmem:[#allocation5 + $0x158] sm:$0xff]  ;;  %v139_v10 = vld [vmem:[#allocation5 + $0x140] sm:$0xff]  ;;  %v132_v11 = vld [vmem:[#allocation5 + $0x108] sm:$0xff] }
  0x1a   :  { %168 = vmatpush.msra.mxu1 %v142_v9  ;;  %v137_v12 = vld [vmem:[#allocation5 + $0x130] sm:$0xff]  ;;  %v136_v13 = vld [vmem:[#allocation5 + $0x128] sm:$0xff]  ;;  %v134_v15 = vld [vmem:[#allocation5 + $0x118] sm:$0xff] }
  0x1b   :  { %149 = vmatpush.msra.mxu0 %v138_v3  ;;  %188 = vmatpush.msra.mxu2 %v143_v5  ;;  %v129_v14 = vld [vmem:[#allocation5 + $0xf0] sm:$0xff]  ;;  %v126_v17 = vld [vmem:[#allocation5 + $0xd8] sm:$0xff]  ;;  %v131_v18 = vld [vmem:[#allocation5 + $0x100] sm:$0xff] }
  0x1c   :  { %169 = vmatpush.msra.mxu1 %v139_v10  ;;  %v133_v16 = vld [vmem:[#allocation5 + $0x110] sm:$0xff]  ;;  %v130_v19 = vld [vmem:[#allocation5 + $0xf8] sm:$0xff]  ;;  %v123_v20 = vld [vmem:[#allocation5 + $0xc0] sm:$0xff] }
  0x1d   :  { %150 = vmatpush.msra.mxu0 %v135_v7  ;;  %189 = vmatpush.msra.mxu2 %v140_v8  ;;  %v128_v21 = vld [vmem:[#allocation5 + $0xe8] sm:$0xff]  ;;  %v127_v22 = vld [vmem:[#allocation5 + $0xe0] sm:$0xff]  ;;  %v125_v24 = vld [vmem:[#allocation5 + $0xd0] sm:$0xff] }
  0x1e   :  { %170 = vmatpush.msra.mxu1 %v136_v13  ;;  %v120_v23 = vld [vmem:[#allocation5 + $0xa8] sm:$0xff]  ;;  %v117_v26 = vld [vmem:[#allocation5 + $0x90] sm:$0xff]  ;;  %v122_v27 = vld [vmem:[#allocation5 + $0xb8] sm:$0xff] }
  0x1f   :  { %151 = vmatpush.msra.mxu0 %v132_v11  ;;  %190 = vmatpush.msra.mxu2 %v137_v12  ;;  %v124_v25 = vld [vmem:[#allocation5 + $0xc8] sm:$0xff]  ;;  %v237_v28 = vld [vmem:[#allocation7 + $0x78] sm:$0xff]  ;;  %v121_v29 = vld [vmem:[#allocation5 + $0xb0] sm:$0xff] }
  0x20   :  { %171 = vmatpush.msra.mxu1 %v133_v16  ;;  %v236_v30 = vld [vmem:[#allocation7 + $0x70] sm:$0xff]  ;;  %v114_v31 = vld [vmem:[#allocation5 + $0x78] sm:$0xff]  ;;  %v119_v32 = vld [vmem:[#allocation5 + $0xa0] sm:$0xff]  ;;  %238 = vmatpush.msra.mxu3 %v237_v28 }
  0x21   :  { %152 = vmatpush.msra.mxu0 %v129_v14  ;;  %191 = vmatpush.msra.mxu2 %v134_v15  ;;  %v118_v33 = vld [vmem:[#allocation5 + $0x98] sm:$0xff]  ;;  %v235_v34 = vld [vmem:[#allocation7 + $0x68] sm:$0xff]  ;;  %v111_v35 = vld [vmem:[#allocation5 + $0x60] sm:$0xff] }
  0x22   :  { %172 = vmatpush.msra.mxu1 %v130_v19  ;;  %v116_v36 = vld [vmem:[#allocation5 + $0x88] sm:$0xff]  ;;  %239 = vmatpush.msra.mxu3 %v236_v30  ;;  %v115_v38 = vld [vmem:[#allocation5 + $0x80] sm:$0xff]  ;;  %v105_v40 = vld [vmem:[#allocation5 + $0x30] sm:$0xff] }
  0x23   :  { %153 = vmatpush.msra.mxu0 %v126_v17  ;;  %192 = vmatpush.msra.mxu2 %v131_v18  ;;  %v108_v37 = vld [vmem:[#allocation5 + $0x48] sm:$0xff]  ;;  %v234_v39 = vld [vmem:[#allocation7 + $0x60] sm:$0xff]  ;;  %v113_v41 = vld [vmem:[#allocation5 + $0x70] sm:$0xff] }
  0x24   :  { %173 = vmatpush.msra.mxu1 %v127_v22  ;;  %v110_v42 = vld [vmem:[#allocation5 + $0x58] sm:$0xff]  ;;  %v112_v43 = vld [vmem:[#allocation5 + $0x68] sm:$0xff]  ;;  %240 = vmatpush.msra.mxu3 %v235_v34  ;;  %v109_v45 = vld [vmem:[#allocation5 + $0x50] sm:$0xff] }
  0x25   :  { %154 = vmatpush.msra.mxu0 %v123_v20  ;;  %193 = vmatpush.msra.mxu2 %v128_v21  ;;  %v233_v44 = vld [vmem:[#allocation7 + $0x58] sm:$0xff]  ;;  %v232_v46 = vld [vmem:[#allocation7 + $0x50] sm:$0xff]  ;;  %v107_v48 = vld [vmem:[#allocation5 + $0x40] sm:$0xff] }
  0x26   :  { %174 = vmatpush.msra.mxu1 %v124_v25  ;;  %241 = vmatpush.msra.mxu3 %v234_v39  ;;  %v102_v47 = vld [vmem:[#allocation5 + $0x18] sm:$0xff]  ;;  %v231_v50 = vld [vmem:[#allocation7 + $0x48] sm:$0xff]  ;;  %v99_v51 = vld [vmem:[#allocation5] sm:$0xff] }
  0x27   :  { %155 = vmatpush.msra.mxu0 %v120_v23  ;;  %194 = vmatpush.msra.mxu2 %v125_v24  ;;  %v106_v49 = vld [vmem:[#allocation5 + $0x38] sm:$0xff]  ;;  %v104_v52 = vld [vmem:[#allocation5 + $0x28] sm:$0xff]  ;;  %v103_v54 = vld [vmem:[#allocation5 + $0x20] sm:$0xff] }
  0x28   :  { %175 = vmatpush.msra.mxu1 %v121_v29  ;;  %242 = vmatpush.msra.mxu3 %v233_v44  ;;  %v569_v53 = vld [vmem:[#allocation3] sm:$0xff]  ;;  %v101_v55 = vld [vmem:[#allocation5 + $0x10] sm:$0xff]  ;;  %v230_v56 = vld [vmem:[#allocation7 + $0x40] sm:$0xff] }
  0x29   :  { %156 = vmatpush.msra.mxu0 %v117_v26  ;;  %195 = vmatpush.msra.mxu2 %v122_v27  ;;  %v100_v57 = vld [vmem:[#allocation5 + $0x8] sm:$0xff]  ;;  %v283_v58 = vld [vmem:[#allocation8 + $0x78] sm:$0xff]  ;;  %v282_v61 = vld [vmem:[#allocation8 + $0x70] sm:$0xff] }
  0x2a   :  { %176 = vmatpush.msra.mxu1 %v118_v33  ;;  %243 = vmatpush.msra.mxu3 %v232_v46  ;;  %v229_v59 = vld [vmem:[#allocation7 + $0x38] sm:$0xff]  ;;  %v228_v62 = vld [vmem:[#allocation7 + $0x30] sm:$0xff]  ;;  %v281_v0 = vld [vmem:[#allocation8 + $0x68] sm:$0xff] }
  0x2b   :  { %157 = vmatpush.msra.mxu0 %v114_v31  ;;  %196 = vmatpush.msra.mxu2 %v119_v32  ;;  %v299_v60 = vld [vmem:[#allocation8 + $0xf8] sm:$0xff]  ;;  %v298_v63 = vld [vmem:[#allocation8 + $0xf0] sm:$0xff]  ;;  %v227_v1 = vld [vmem:[#allocation7 + $0x28] sm:$0xff] }
  0x2c   :  { %177 = vmatpush.msra.mxu1 %v115_v38  ;;  %244 = vmatpush.msra.mxu3 %v231_v50  ;;  %v297_v2 = vld [vmem:[#allocation8 + $0xe8] sm:$0xff]  ;;  %v280_v3 = vld [vmem:[#allocation8 + $0x60] sm:$0xff]  ;;  %v279_v6 = vld [vmem:[#allocation8 + $0x58] sm:$0xff] }
  0x2d   :  { %158 = vmatpush.msra.mxu0 %v111_v35  ;;  %197 = vmatpush.msra.mxu2 %v116_v36  ;;  %v226_v4 = vld [vmem:[#allocation7 + $0x20] sm:$0xff]  ;;  %v225_v7 = vld [vmem:[#allocation7 + $0x18] sm:$0xff]  ;;  %v278_v8 = vld [vmem:[#allocation8 + $0x50] sm:$0xff] }
  0x2e   :  { %178 = vmatpush.msra.mxu1 %v112_v43  ;;  %245 = vmatpush.msra.mxu3 %v230_v56  ;;  %v296_v5 = vld [vmem:[#allocation8 + $0xe0] sm:$0xff]  ;;  %v295_v9 = vld [vmem:[#allocation8 + $0xd8] sm:$0xff]  ;;  %v224_v10 = vld [vmem:[#allocation7 + $0x10] sm:$0xff] }
  0x2f   :  { %159 = vmatpush.msra.mxu0 %v108_v37  ;;  %198 = vmatpush.msra.mxu2 %v113_v41  ;;  %v277_v11 = vld [vmem:[#allocation8 + $0x48] sm:$0xff]  ;;  %v294_v12 = vld [vmem:[#allocation8 + $0xd0] sm:$0xff]  ;;  %v276_v14 = vld [vmem:[#allocation8 + $0x40] sm:$0xff] }
  0x30   :  { %179 = vmatpush.msra.mxu1 %v109_v45  ;;  %246 = vmatpush.msra.mxu3 %v229_v59  ;;  %v223_v13 = vld [vmem:[#allocation7 + $0x8] sm:$0xff]  ;;  %v222_v16 = vld [vmem:[#allocation7] sm:$0xff]  ;;  %v275_v17 = vld [vmem:[#allocation8 + $0x38] sm:$0xff] }
  0x31   :  { %160 = vmatpush.msra.mxu0 %v105_v40  ;;  %199 = vmatpush.msra.mxu2 %v110_v42  ;;  %v293_v15 = vld [vmem:[#allocation8 + $0xc8] sm:$0xff]  ;;  %v292_v18 = vld [vmem:[#allocation8 + $0xc0] sm:$0xff]  ;;  %v274_v19 = vld [vmem:[#allocation8 + $0x30] sm:$0xff] }
  0x32   :  { %180 = vmatpush.msra.mxu1 %v106_v49  ;;  %247 = vmatpush.msra.mxu3 %v228_v62  ;;  %v291_v20 = vld [vmem:[#allocation8 + $0xb8] sm:$0xff]  ;;  %v273_v21 = vld [vmem:[#allocation8 + $0x28] sm:$0xff]  ;;  %v290_v22 = vld [vmem:[#allocation8 + $0xb0] sm:$0xff] }
  0x33   :  { %161 = vmatpush.msra.mxu0 %v102_v47  ;;  %200 = vmatpush.msra.mxu2 %v107_v48  ;;  %v272_v23 = vld [vmem:[#allocation8 + $0x20] sm:$0xff]  ;;  %v289_v24 = vld [vmem:[#allocation8 + $0xa8] sm:$0xff]  ;;  %v271_v25 = vld [vmem:[#allocation8 + $0x18] sm:$0xff] }
  0x34   :  { %181 = vmatpush.msra.mxu1 %v103_v54  ;;  %248 = vmatpush.msra.mxu3 %v227_v1  ;;  %v288_v26 = vld [vmem:[#allocation8 + $0xa0] sm:$0xff]  ;;  %v270_v27 = vld [vmem:[#allocation8 + $0x10] sm:$0xff]  ;;  %v287_v28 = vld [vmem:[#allocation8 + $0x98] sm:$0xff] }
  0x35   :  { %162 = vmatpush.msra.mxu0 %v99_v51  ;;  %201 = vmatpush.msra.mxu2 %v104_v52  ;;  %v269_v29 = vld [vmem:[#allocation8 + $0x8] sm:$0xff]  ;;  %v286_v30 = vld [vmem:[#allocation8 + $0x90] sm:$0xff]  ;;  %v268_v31 = vld [vmem:[#allocation8] sm:$0xff] }
  0x36   :  { %163 = vmatmul.f32.vlgmr.msra.gmra.mxu0 %v569_v53  ;;  %182 = vmatpush.msra.mxu1 %v100_v57  ;;  %v285_v32 = vld [vmem:[#allocation8 + $0x88] sm:$0xff]  ;;  %v284_v33 = vld [vmem:[#allocation8 + $0x80] sm:$0xff]  ;;  %v207_v34 = vld [vmem:[%s602_s4] sm:$0x3] }
  0x37   :  { %202 = vmatpush.msra.mxu2 %v101_v55  ;;  %183 = vmatmul.f32.vlgmr.msra.gmra.mxu1 %v569_v53  ;;  %v383_v35 = vld [vmem:[%s601_s3] ss:$0 sm:$0xff]  ;;  %v209_v37 = vperm.slane %v207_v34, 0  ;;  %v210_v43 = vperm.slane %v207_v34, 1  ;;  %v384_v50 = vld [vmem:[%s601_s3 + $0x1] ss:$0 sm:$0xff] }
  0x38   :  { %203 = vmatmul.f32.vlgmr.msra.gmra.mxu2 %v569_v53  ;;  %304 = vmatpush.msrb.mxu0 %v283_v58  ;;  %v385_v48 = vld [vmem:[%s604_s6] ss:$0 sm:$0xff] }
  0x39   :  { %324 = vmatpush.msrb.mxu1 %v299_v60  ;;  %249 = vmatpush.msra.mxu3 %v226_v4  ;;  %v386_v57 = vld [vmem:[%s605_s7] ss:$0 sm:$0xff] }
  0x3a   :  { %305 = vmatpush.msrb.mxu0 %v282_v61  ;;  %v387_v62 = vld [vmem:[%s606_s8] ss:$0 sm:$0xff] }
  0x3b   :  { %325 = vmatpush.msrb.mxu1 %v298_v63  ;;  %250 = vmatpush.msra.mxu3 %v225_v7 }
  0x3c   :  { %306 = vmatpush.msrb.mxu0 %v281_v0 }
  0x3d   :  { %326 = vmatpush.msrb.mxu1 %v297_v2  ;;  %251 = vmatpush.msra.mxu3 %v224_v10 }
  0x3e   :  { %307 = vmatpush.msrb.mxu0 %v280_v3 }
  0x3f   :  { %327 = vmatpush.msrb.mxu1 %v296_v5  ;;  %252 = vmatpush.msra.mxu3 %v223_v13 }
  0x40   :  { %308 = vmatpush.msrb.mxu0 %v279_v6 }
  0x41   :  { %328 = vmatpush.msrb.mxu1 %v295_v9  ;;  %253 = vmatpush.msra.mxu3 %v222_v16 }
  0x42   :  { %309 = vmatpush.msrb.mxu0 %v278_v8 }
  0x43   :  { %329 = vmatpush.msrb.mxu1 %v294_v12 }
  0x44   :  { %310 = vmatpush.msrb.mxu0 %v277_v11 }
  0x45   :  { %330 = vmatpush.msrb.mxu1 %v293_v15 }
  0x46   :  { %311 = vmatpush.msrb.mxu0 %v276_v14 }
  0x47   :  { %331 = vmatpush.msrb.mxu1 %v292_v18 }
  0x48   :  { %312 = vmatpush.msrb.mxu0 %v275_v17 }
  0x49   :  { %332 = vmatpush.msrb.mxu1 %v291_v20 }
  0x4a   :  { %313 = vmatpush.msrb.mxu0 %v274_v19 }
  0x4b   :  { %333 = vmatpush.msrb.mxu1 %v290_v22 }
  0x4c   :  { %314 = vmatpush.msrb.mxu0 %v273_v21 }
  0x4d   :  { %334 = vmatpush.msrb.mxu1 %v289_v24 }
  0x4e   :  { %315 = vmatpush.msrb.mxu0 %v272_v23 }
  0x4f   :  { %335 = vmatpush.msrb.mxu1 %v288_v26 }
  0x50   :  { %316 = vmatpush.msrb.mxu0 %v271_v25 }
  0x51   :  { %336 = vmatpush.msrb.mxu1 %v287_v28 }
  0x52   :  { %317 = vmatpush.msrb.mxu0 %v270_v27 }
  0x53   :  { %337 = vmatpush.msrb.mxu1 %v286_v30 }
  0x54   :  { %318 = vmatpush.msrb.mxu0 %v269_v29 }
  0x55   :  { %338 = vmatpush.msrb.mxu1 %v285_v32 }
  0x56   :  { %319 = vmatpush.msrb.mxu0 %v268_v31 }
  0x57   :  { %339 = vmatpush.msrb.mxu1 %v284_v33 }
  0xb3   :  { %v164_v36 = vpop.f32.mrf.mxu0 }
  0xb4   :  { %v215_v38 = vmul.f32 %v164_v36, %v569_v53  ;;  %v184_v40 = vpop.f32.mrf.mxu1 }
  0xb5   :  { %v213_v41 = vadd.f32 %v209_v37, %v184_v40 }
  0xb6   :  { %v220_v39 = vadd.f32 %v383_v35, %v215_v38 }
  0xb7   :  { %v266_v44 = vmax.f32 %v213_v41, 0.0 }
  0xb8   :  { %v221_v42 = vadd.f32 %v220_v39, %v569_v53 }
  0xb9   :  { %320 = vmatmul.f32.vlgmr.msrb.gmra.mxu0 %v266_v44 }
  0xba   :  { %254 = vmatmul.f32.vlgmr.msra.gmra.mxu3 %v221_v42 }
  0xbb   :  { %v204_v45 = vpop.f32.mrf.mxu2 }
  0xbc   :  { %v214_v46 = vadd.f32 %v210_v43, %v204_v45 }
  0xbe   :  { %v267_v47 = vmax.f32 %v214_v46, 0.0 }
  0xc0   :  { %340 = vmatmul.f32.vlgmr.msrb.gmra.mxu1 %v267_v47 }
 0x136   :  { %v321_v49 = vpop.f32.mrf.mxu0 }
 0x137   :  { %v322_v54 = vadd.f32 %v385_v48, %v321_v49 }
 0x13d   :  { %v255_v51 = vpop.f32.mrf.mxu3  ;;  %v341_v55 = vpop.f32.mrf.mxu1 }
 0x13e   :  { %v258_v52 = vmul.f32 %v255_v51, %v569_v53  ;;  %v342_v59 = vadd.f32 %v341_v55, %v322_v54  ;;  %v388_v53 = vld [vmem:[#allocation2] ss:$0 sm:$0xff] }
 0x140   :  { %v264_v56 = vadd.f32 %v384_v50, %v258_v52  ;;  %v344_v61 = vmax.f32 %v342_v59, 0.0 }
 0x142   :  { %v265_v58 = vadd.f32 %v264_v56, %v221_v42  ;;  %v356_v63 = vmul.f32 %v387_v62, %v344_v61 }
 0x144   :  { %v349_v60 = vmul.f32 %v386_v57, %v265_v58 }
 0x146   :  { %350 = vadd.xlane.f32.xlu0 %v349_v60 }
 0x14e   :  { %357 = vadd.xlane.f32.xlu0 %v356_v63 }
 0x1b9   :  { %v351_v0 = vpop.xlane.xlu0 %350 }
 0x1c1   :  { %v358_v1 = vpop.xlane.xlu0 %357 }
 0x1c2   :  { %v359_v2 = vadd.f32 %v358_v1, %v351_v0 }
 0x1c4   :  { %v364_v3 = vadd.f32 %v388_v53, %v359_v2 }
 0x1c6   :  { %366 = vst.msk [vmem:[%s608_s10] sm:$0xff] %vm365_vm0, %v364_v3 }
 0x1c7   :  { %371 = vsyncpa [#allocation4], 1 }
 0x1c8   :  { %372 = vsyncpa [#allocation6], 1 }
 0x1c9   :  { %373 = vsyncpa [#allocation9], 1 }

</bundles_post_ra>
